<compile_context>
chip_gen: v7x
topology: tpu7x:2x2x1
jax: 0.10.0
libtpu: 0.0.40
codegen_flags: <defaults>
</compile_context>

<pallas_src>
import functools

import jax
import jax.numpy as jnp
from jax.experimental import pallas as pl
from jax.experimental.pallas import tpu as pltpu


# ---------------------------------------------------------------------------
# Fused single-pass kernel (whole flattened array resident in VMEM).
# ---------------------------------------------------------------------------
def _fused_kernel(x_ref, o_ref, *, eps, m_total):
    x = x_ref[...].astype(jnp.float32)
    mean2 = jnp.sum(x * x, axis=0, keepdims=True) * (1.0 / m_total)
    inv_coeff = 1.0 / jnp.sqrt(mean2 + eps)           # (1, C)
    o_ref[...] = (x * inv_coeff).astype(o_ref.dtype)


# ---------------------------------------------------------------------------
# Pass 1: tiled sum-of-squares over the flattened leading dims, with the
# mean / eps / rsqrt folded into a finalize epilogue. Output = inv_coeff (1,C).
# Ragged last tile handled by masking rows >= m_total.
# ---------------------------------------------------------------------------
def _sumsq_rsqrt_kernel(x_ref, inv_ref, *, eps, m_total, tile_rows):
    i = pl.program_id(0)

    @pl.when(i == 0)
    def _():
        inv_ref[...] = jnp.zeros_like(inv_ref)

    x = x_ref[...].astype(jnp.float32)
    if (m_total % tile_rows) != 0:
        row = i * tile_rows + jax.lax.broadcasted_iota(jnp.int32, x.shape, 0)
        x = jnp.where(row < m_total, x, 0.0)
    inv_ref[...] += jnp.sum(x * x, axis=0, keepdims=True)

    @pl.when(i == pl.num_programs(0) - 1)
    def _():
        inv_ref[...] = 1.0 / jnp.sqrt(inv_ref[...] * (1.0 / m_total) + eps)


# ---------------------------------------------------------------------------
# Pass 2: pure broadcast-multiply: y = x * inv_coeff
# ---------------------------------------------------------------------------
def _normalize_kernel(x_ref, inv_ref, o_ref):
    o_ref[...] = (x_ref[...].astype(jnp.float32) * inv_ref[...]).astype(o_ref.dtype)


def _round_up(a, b):
    return (a + b - 1) // b * b


def qbn_rm1d(x, eps=1e-5, *, tile_rows=None, force_two_pass=False):
    """Pallas implementation of QBN_RM1d.forward. x: (..., C)."""
    orig_shape = x.shape
    C = orig_shape[-1]
    x2d = x.reshape(-1, C)
    M = x2d.shape[0]
    itemsize = jnp.dtype(x.dtype).itemsize

    # ---------------- fused single-pass path (input fits in VMEM) ----------
    # Conservative budget so the single un-pipelined block fits the default
    # scoped VMEM on every generation (v5e/v6e/v7x).
    fused_budget_bytes = 4 * 1024 * 1024
    if (not force_two_pass) and (M * C * 4) <= fused_budget_bytes:
        y2d = pl.pallas_call(
            functools.partial(_fused_kernel, eps=eps, m_total=M),
            out_shape=jax.ShapeDtypeStruct((M, C), x.dtype),
        )(x2d)
        return y2d.reshape(orig_shape)

    # ---------------- two-pass tiled path -----------------------------------
    # Tile sizing: ~2 MiB input block (multiple of 8 rows). Pass-2 footprint is
    # (in + out) * 2 pipeline buffers ~= 8 MiB, within default scoped VMEM on
    # all generations (incl. v7x's smaller VMEM).
    if tile_rows is None:
        target_bytes = 2 * 1024 * 1024
        tr = max(8, (target_bytes // (C * itemsize)) // 8 * 8)
        tile_rows = int(min(tr, _round_up(M, 8)))
    assert tile_rows % 8 == 0, "tile_rows must be a multiple of 8"
    n_tiles = pl.cdiv(M, tile_rows)

    # Pass 1: inv_coeff = 1 / sqrt(mean(x^2) + eps), shape (1, C).
    inv_coeff = pl.pallas_call(
        functools.partial(
            _sumsq_rsqrt_kernel, eps=eps, m_total=M, tile_rows=tile_rows),
        out_shape=jax.ShapeDtypeStruct((1, C), jnp.float32),
        grid_spec=pltpu.PrefetchScalarGridSpec(
            num_scalar_prefetch=0,
            grid=(n_tiles,),
            in_specs=[pl.BlockSpec((tile_rows, C), lambda i: (i, 0))],
            out_specs=pl.BlockSpec((1, C), lambda i: (0, 0)),
        ),
        compiler_params=pltpu.CompilerParams(
            dimension_semantics=("arbitrary",)),
    )(x2d)

    # Pass 2: y = x * inv_coeff (broadcast over rows). OOB rows of the ragged
    # last tile are discarded by the pipeline on writeback.
    y2d = pl.pallas_call(
        _normalize_kernel,
        out_shape=jax.ShapeDtypeStruct((M, C), x.dtype),
        grid_spec=pltpu.PrefetchScalarGridSpec(
            num_scalar_prefetch=0,
            grid=(n_tiles,),
            in_specs=[
                pl.BlockSpec((tile_rows, C), lambda i: (i, 0)),
                pl.BlockSpec((1, C), lambda i: (0, 0)),
            ],
            out_specs=pl.BlockSpec((tile_rows, C), lambda i: (i, 0)),
        ),
        compiler_params=pltpu.CompilerParams(
            dimension_semantics=("parallel",)),
    )(x2d, inv_coeff)

    return y2d.reshape(orig_shape)


def qbn_rm1d_ref(x, eps=1e-5):
    """Pure-JAX reference mirroring the PyTorch forward."""
    C = x.shape[-1]
    mean2 = jnp.mean((x * x).reshape(-1, C), axis=0)
    coeff = jnp.sqrt(mean2 + eps).reshape((1,) * (x.ndim - 1) + (-1,))
    return x / coeff


if __name__ == "__main__":
    key = jax.random.PRNGKey(0)

    # Shape implied by the module's coefficient.view(1, 1, -1): (batch, seq, C).
    # num_features = 128 (lane-aligned), batch=2, seq=8  -> fused path.
    B, N, C = 2, 8, 128
    x = jax.random.normal(key, (B, N, C), dtype=jnp.float32)
    y = jax.block_until_ready(qbn_rm1d(x, eps=1e-5))
    y_ref = qbn_rm1d_ref(x, eps=1e-5)
    assert y.shape == x.shape and y.dtype == x.dtype
    assert jnp.allclose(y, y_ref, rtol=1e-5, atol=1e-5)

    # Exercise the tiled two-pass path with a ragged last tile (M=400, tile=128).
    x2 = jax.random.normal(key, (2, 200, 128), dtype=jnp.float32)
    y2 = jax.block_until_ready(
        qbn_rm1d(x2, eps=1e-5, force_two_pass=True, tile_rows=128))
    y2_ref = qbn_rm1d_ref(x2, eps=1e-5)
    assert y2.shape == x2.shape and y2.dtype == x2.dtype
    assert jnp.allclose(y2, y2_ref, rtol=1e-5, atol=1e-5)

    print("KERNEL_OK")
</pallas_src>

<mosaic_0001>
module attributes {stable_mosaic.version = 11 : i64} {
  func.func @_fused_kernel(%arg0: memref<16x128xf32, #tpu.memory_space<vmem>>, %arg1: memref<16x128xf32, #tpu.memory_space<vmem>>) attributes {dimension_semantics = [], scalar_prefetch = 0 : i64, scratch_operands = 0 : i64, tpu.core_type = #tpu.core_type<tc>} {
    %c0 = arith.constant 0 : index
    %c0_0 = arith.constant 0 : index
    %0 = vector.load %arg0[%c0, %c0_0] : memref<16x128xf32, #tpu.memory_space<vmem>>, vector<16x128xf32>
    %1 = arith.mulf %0, %0 : vector<16x128xf32>
    %cst = arith.constant dense<0.000000e+00> : vector<128xf32>
    %2 = vector.multi_reduction <add>, %1, %cst [0] : vector<16x128xf32> to vector<128xf32>
    %3 = vector.shape_cast %2 : vector<128xf32> to vector<1x128xf32>
    %cst_1 = arith.constant 6.250000e-02 : f32
    %4 = vector.broadcast %cst_1 : f32 to vector<1x128xf32>
    %5 = arith.mulf %3, %4 : vector<1x128xf32>
    %cst_2 = arith.constant 9.99999974E-6 : f32
    %6 = vector.broadcast %cst_2 : f32 to vector<1x128xf32>
    %7 = arith.addf %5, %6 : vector<1x128xf32>
    %8 = math.sqrt %7 : vector<1x128xf32>
    %cst_3 = arith.constant 1.000000e+00 : f32
    %9 = vector.broadcast %cst_3 : f32 to vector<1x128xf32>
    %10 = arith.divf %9, %8 : vector<1x128xf32>
    %11 = vector.broadcast %10 : vector<1x128xf32> to vector<16x128xf32>
    %12 = arith.mulf %0, %11 : vector<16x128xf32>
    %c0_4 = arith.constant 0 : index
    %c0_5 = arith.constant 0 : index
    %13 = vector.load %arg1[%c0_4, %c0_5] : memref<16x128xf32, #tpu.memory_space<vmem>>, vector<16x128xf32>
    tpu.vector_store %arg1[%c0_4, %c0_5], %12 {strides = array<i32>} : memref<16x128xf32, #tpu.memory_space<vmem>>, vector<16x128xf32>,
    return
  }
}

</mosaic_0001>

<bundles_post_ra>
// kernel: tpu_custom_call.1
= control target key start
LH: loop header
LB: loop body
LE: loop exit
PB: predicated region body
PF: predicated region fallthrough
CT: control target
= control target key end

     0   :  { %6 = vsyncpa [#allocation3], 0  ;;  %s166_s0 = inlined_call_operand.hbm [shape: f32[16,128], index: 0, kind: input, shape index: {}]   ;;  %s167_s1 = inlined_call_operand.hbm [shape: f32[16,128], index: 1, kind: output, shape index: {}]  }
   0x1   :  { %7 = vsyncpa [#allocation4], 0  ;;  %s122_s6 = smov [#allocation2]   ;;  %s74_s10 = scalar_lea.hbm %s166_s0, 256 }
   0x2   :  { %s13_s7 = sshll.u32 %s122_s6, 4  ;;  %p75_p0 = scmp.ne.s32.totalorder %s166_s0, %s74_s10  ;;  %s14_s7 = int_to_ptr.vmem [resolvable:$true] %s13_s7 }
   0x3   :  { %p78_p1 = scmp.lt.u32.totalorder %s74_s10, %s166_s0 }
   0x5   :  { %p80_p2 = pnand %p78_p1, %p75_p0 }
   0x7   :  { %83 = shalt.err (!%p80_p2)
}
   0x8   :  { %s84_s15 = scalar_lea.vmem %s14_s7, 256  ;;  %p89_p4 = scmp.lt.s32.totalorder %s14_s7, %s14_s7 }
   0x9   :  { %p85_p3 = scmp.ne.s32.totalorder %s14_s7, %s84_s15  ;;  %p90_p5 = scmp.lt.s32.totalorder %s84_s15, %s84_s15 }
   0xb   :  { %p91_p6 = por %p90_p5, %p89_p4 }
   0xd   :  { %p92_p7 = pnand %p91_p6, %p85_p3 }
   0xf   :  { %95 = shalt.err (!%p92_p7)
}
  0x10   :  { %s123_s16 = smov 128   ;;  %s124_s17 = smov 8  }
  0x11   :  { %19 = dma.hbm_to_vmem [thread:$0]  %s166_s0, 256, %s14_s7, [#allocation3], %s123_s16, %s123_s16, %s124_s17  }
  0x12   :  { %118 = dma.done.wait [#allocation3], 256  }
  0x13   :  { %119 = vsyncadd [#allocation3], 4294967040  ;;  %v23_v0 = vld [vmem:[#allocation2] sm:$0xff]  ;;  %v24_v1 = vld [vmem:[#allocation2 + $0x8] sm:$0xff]  ;;  %s125_s0 = smov [#allocation5]  }
  0x14   :  { %v25_v2 = vmul.f32 %v23_v0, %v23_v0  ;;  %v26_v3 = vmul.f32 %v24_v1, %v24_v1  ;;  %s54_s20 = sshll.u32 %s125_s0, 4  ;;  %s55_s20 = int_to_ptr.vmem [resolvable:$true] %s54_s20 }
  0x15   :  { %s96_s21 = scalar_lea.vmem %s55_s20, 256  ;;  %p101_p9 = scmp.lt.s32.totalorder %s55_s20, %s55_s20 }
  0x16   :  { %v27_v4 = vadd.f32 %v26_v3, %v25_v2  ;;  %p97_p8 = scmp.ne.s32.totalorder %s55_s20, %s96_s21  ;;  %p102_p10 = scmp.lt.s32.totalorder %s96_s21, %s96_s21 }
  0x18   :  { %v28_v5 = vrot.slane %v27_v4, 4  ;;  %p103_p11 = por %p102_p10, %p101_p9 }
  0x1a   :  { %v29_v6 = vadd.f32 %v28_v5, %v27_v4  ;;  %p104_p12 = pnand %p103_p11, %p97_p8 }
  0x1c   :  { %v30_v7 = vrot.slane %v29_v6, 2 }
  0x1e   :  { %v31_v8 = vadd.f32 %v30_v7, %v29_v6 }
  0x20   :  { %v32_v9 = vrot.slane %v31_v8, 1 }
  0x22   :  { %v33_v10 = vadd.f32 %v32_v9, %v31_v8 }
  0x24   :  { %v34_v11 = vmul.f32 0.0625, %v33_v10 }
  0x26   :  { %v35_v12 = vadd.f32 1e-05, %v34_v11 }
  0x28   :  { %70 = vrsqrt.f32 %v35_v12  ;;  %vm38_vm0 = vcmp.eq.f32.partialorder %v35_v12, inf  ;;  %v41_v14 = vand.u32 2147483648, %v35_v12  ;;  %vm40_vm1 = vcmp.eq.f32.partialorder %v35_v12, 0.0 }
  0x32   :  { %v71_v13 = vpop.eup %70 }
  0x33   :  { %v37_v15 = vmul.f32 %v71_v13, %v35_v12 }
  0x35   :  { %v39_v16 = vsel %vm38_vm0, %v35_v12, %v37_v15 }
  0x36   :  { %v42_v17 = vsel %vm40_vm1, %v41_v14, %v39_v16 }
  0x37   :  { %72 = vrcp.f32 %v42_v17 }
  0x41   :  { %v73_v18 = vpop.eup %72 }
  0x42   :  { %v45_v19 = vmul.f32 %v73_v18, %v23_v0  ;;  %v46_v20 = vmul.f32 %v73_v18, %v24_v1 }
  0x44   :  { %47 = vst [vmem:[#allocation5] sm:$0xff] %v45_v19  ;;  %48 = vst [vmem:[#allocation5 + $0x8] sm:$0xff] %v46_v20 }
  0x45   :  { %107 = shalt.err (!%p104_p12)
}
  0x46   :  { %s108_s24 = scalar_lea.hbm %s167_s1, 256 }
  0x47   :  { %p109_p13 = scmp.ne.s32.totalorder %s167_s1, %s108_s24  ;;  %p112_p0 = scmp.lt.u32.totalorder %s108_s24, %s167_s1 }
  0x49   :  { %p114_p1 = pnand %p112_p0, %p109_p13 }
  0x4b   :  { %117 = shalt.err (!%p114_p1)
}
  0x4c   :  { %60 = dma.vmem_to_hbm [thread:$0]  %s55_s20, 256, %s167_s1, [#allocation4], %s123_s16, %s123_s16, %s124_s17  }
  0x4d   :  { %120 = dma.done.wait [#allocation4], 256  }
  0x4e   :  { %121 = vsyncadd [#allocation4], 4294967040 }
  0x4f   :  { %64 = vsyncpa [#allocation3], 1 }
  0x50   :  { %65 = vsyncpa [#allocation4], 1 }

</bundles_post_ra>
